<compile_context>
chip_gen: v7x
topology: tpu7x:2x2x1
jax: 0.10.0
libtpu: 0.0.40
codegen_flags: <defaults>
</compile_context>

<pallas_src>
import functools
import math

import jax
import jax.numpy as jnp
from jax import lax
from jax.experimental import pallas as pl
from jax.experimental.pallas import tpu as pltpu

_LANES = 128


def _sqdiff_partial_kernel(p_ref, t_ref, o_ref, *, tm, width, valid_rows, needs_mask):
    """Per-tile partial: sum over rows of (y_true - y_pred)^2, lane-dense (1, width)."""
    # Upcast in-kernel (free on the VPU) so bf16 callers only pay bf16 HBM bytes.
    diff = t_ref[...].astype(jnp.float32) - p_ref[...].astype(jnp.float32)
    sq = diff * diff
    if needs_mask:  # static: only emitted when rows % tm != 0 (partial tail tile)
        row = lax.broadcasted_iota(jnp.int32, (tm, width), 0) + pl.program_id(0) * tm
        sq = jnp.where(row < valid_rows, sq, 0.0)
    # Reduce only over the row (sublane/major) axis -> lane-dense partial.
    o_ref[...] = jnp.sum(sq, axis=0, keepdims=True)


def weighted_mse_loss(weight, y_pred, y_true, *, block_rows=4096):
    """weight: (F,) / (1, F) / scalar; y_pred/y_true: (..., F). Returns scalar f32."""
    assert y_pred.shape == y_true.shape
    F = y_pred.shape[-1]
    n_elems = y_pred.size  # global divisor (true element count, never the padded one)

    w = jnp.asarray(weight, jnp.float32).reshape(-1)
    if w.shape[0] == 1:
        w = jnp.broadcast_to(w, (F,))
    assert w.shape[0] == F, "weight must broadcast over the feature axis"

    # ---- lane-dense flat view: width = lcm(F, 128) (multiple of 128) --------
    width = (F * _LANES) // math.gcd(F, _LANES)
    flat_p = y_pred.reshape(-1)  # free row-major reshape
    flat_t = y_true.reshape(-1)
    n_pad = (-n_elems) % width
    if n_pad:
        # TODO(synk): irregular totals pay one extra copy here (<= width-1 zeros
        # appended, but jnp.pad rewrites the array).  The dominant GRU shapes
        # (F=32, M % 4 == 0) take the zero-copy path.  Padded elements have
        # diff == 0 and contribute nothing to the sum.
        flat_p = jnp.pad(flat_p, (0, n_pad))
        flat_t = jnp.pad(flat_t, (0, n_pad))
    rows = (n_elems + n_pad) // width
    xp = flat_p.reshape(rows, width)
    xt = flat_t.reshape(rows, width)

    # ---- row tiling: big tiles, no tile-multiple padding ---------------------
    # Keep per-tile bytes ~ block_rows * 128 * dtype regardless of width; tile
    # rows are a multiple of 32 (safe sublane granularity for f32/bf16/int8).
    target = max(32, (block_rows * _LANES // width) // 32 * 32)
    if rows <= target:
        tm = rows          # single full-extent block: always a legal block shape
    else:
        tm = target        # multiple of 32; tail tile handled by in-kernel mask
    grid_m = pl.cdiv(rows, tm)
    needs_mask = (rows % tm) != 0

    kernel = functools.partial(
        _sqdiff_partial_kernel,
        tm=tm, width=width, valid_rows=rows, needs_mask=needs_mask)

    partials = pl.pallas_call(
        kernel,
        out_shape=jax.ShapeDtypeStruct((grid_m, 1, width), jnp.float32),
        grid=(grid_m,),
        in_specs=[
            pl.BlockSpec((tm, width), lambda i: (i, 0)),   # y_pred tile
            pl.BlockSpec((tm, width), lambda i: (i, 0)),   # y_true tile
        ],
        out_specs=pl.BlockSpec((None, 1, width), lambda i: (i, 0, 0)),
        compiler_params=pltpu.CompilerParams(
            dimension_semantics=("parallel",),
            vmem_limit_bytes=32 * 1024 * 1024),
    )(xp, xt)

    # ---- tiny epilogue: periodic weight row + global mean -------------------
    w_row = jnp.tile(w, width // F)                  # (width,), width % F == 0
    per_lane = jnp.sum(partials, axis=(0, 1))        # (width,) f32
    return jnp.sum(per_lane * w_row) / jnp.float32(n_elems)


if __name__ == "__main__":
    key = jax.random.PRNGKey(0)
    k_w, k_p, k_t = jax.random.split(key, 3)

    # GRU prediction setup: batch=2, seq=8 -> 16 rows, 32 per-feature weights.
    M, F = 2 * 8, 32
    weight = jax.random.uniform(k_w, (F,), dtype=jnp.float32) + 0.5
    y_pred = jax.random.normal(k_p, (M, F), dtype=jnp.float32)
    y_true = jax.random.normal(k_t, (M, F), dtype=jnp.float32)

    loss = weighted_mse_loss(weight, y_pred, y_true)
    jax.block_until_ready(loss)
    ref = jnp.mean(weight[None, :] * (y_true - y_pred) ** 2)
    assert jnp.allclose(loss, ref, rtol=1e-4, atol=1e-6), (loss, ref)

    # Larger M: zero-copy lane-dense path (32*4100 % 128 == 0), single big tile.
    M2 = 4100
    kp2, kt2 = jax.random.split(k_p)
    yp2 = jax.random.normal(kp2, (M2, F), dtype=jnp.float32)
    yt2 = jax.random.normal(kt2, (M2, F), dtype=jnp.float32)
    ref2 = jnp.mean(weight[None, :] * (yt2 - yp2) ** 2)
    loss2 = weighted_mse_loss(weight, yp2, yt2)
    jax.block_until_ready(loss2)
    assert jnp.allclose(loss2, ref2, rtol=1e-4, atol=1e-5), (loss2, ref2)

    # Small block_rows forces grid > 1 + in-kernel tail masking (1025 rows / 256).
    loss2b = weighted_mse_loss(weight, yp2, yt2, block_rows=256)
    jax.block_until_ready(loss2b)
    assert jnp.allclose(loss2b, ref2, rtol=1e-4, atol=1e-5), (loss2b, ref2)

    # Native bf16 ingestion: kernel upcasts in-VMEM, HBM reads stay bf16-sized.
    yp2b = yp2.astype(jnp.bfloat16)
    yt2b = yt2.astype(jnp.bfloat16)
    loss_bf16 = weighted_mse_loss(weight, yp2b, yt2b)
    jax.block_until_ready(loss_bf16)
    ref_bf16 = jnp.mean(weight[None, :]
                        * (yt2b.astype(jnp.float32) - yp2b.astype(jnp.float32)) ** 2)
    assert jnp.allclose(loss_bf16, ref_bf16, rtol=1e-3, atol=1e-4), (loss_bf16, ref_bf16)

    # F not dividing 128 (F=48): lane-dense via width=lcm(48,128)=384, small flat pad.
    M3, F3 = 20, 48
    kw3, kp3, kt3 = jax.random.split(k_t, 3)
    w3 = jax.random.uniform(kw3, (F3,), dtype=jnp.float32) + 0.5
    yp3 = jax.random.normal(kp3, (M3, F3), dtype=jnp.float32)
    yt3 = jax.random.normal(kt3, (M3, F3), dtype=jnp.float32)
    loss3 = weighted_mse_loss(w3, yp3, yt3)
    jax.block_until_ready(loss3)
    ref3 = jnp.mean(w3[None, :] * (yt3 - yp3) ** 2)
    assert jnp.allclose(loss3, ref3, rtol=1e-4, atol=1e-6), (loss3, ref3)

    print("KERNEL_OK")
</pallas_src>

<mosaic_0001>
module attributes {stable_mosaic.version = 11 : i64} {
  func.func @_sqdiff_partial_kernel(%arg0: i32, %arg1: memref<4x128xf32, #tpu.memory_space<vmem>>, %arg2: memref<4x128xf32, #tpu.memory_space<vmem>>, %arg3: memref<1x1x128xf32, #tpu.memory_space<vmem>>) attributes {dimension_semantics = [#tpu.dimension_semantics<parallel>], iteration_bounds = array<i64: 1>, scalar_prefetch = 0 : i64, scratch_operands = 0 : i64, tpu.core_type = #tpu.core_type<tc>, window_params = [{transform_indices = @transform_0, window_bounds = array<i64: 4, 128>}, {transform_indices = @transform_1, window_bounds = array<i64: 4, 128>}, {transform_indices = @transform_2, window_bounds = array<i64: 1, 1, 128>}]} {
    %c0 = arith.constant 0 : index
    %c0_0 = arith.constant 0 : index
    %0 = vector.load %arg2[%c0, %c0_0] : memref<4x128xf32, #tpu.memory_space<vmem>>, vector<4x128xf32>
    %c0_1 = arith.constant 0 : index
    %c0_2 = arith.constant 0 : index
    %1 = vector.load %arg1[%c0_1, %c0_2] : memref<4x128xf32, #tpu.memory_space<vmem>>, vector<4x128xf32>
    %2 = arith.subf %0, %1 : vector<4x128xf32>
    %3 = arith.mulf %2, %2 : vector<4x128xf32>
    %cst = arith.constant dense<0.000000e+00> : vector<128xf32>
    %4 = vector.multi_reduction <add>, %3, %cst [0] : vector<4x128xf32> to vector<128xf32>
    %5 = vector.shape_cast %4 : vector<128xf32> to vector<1x128xf32>
    %c0_3 = arith.constant 0 : index
    %c0_4 = arith.constant 0 : index
    %c0_5 = arith.constant 0 : index
    %6 = vector.load %arg3[%c0_3, %c0_4, %c0_5] : memref<1x1x128xf32, #tpu.memory_space<vmem>>, vector<1x1x128xf32>
    %7 = vector.shape_cast %6 : vector<1x1x128xf32> to vector<1x128xf32>
    %8 = vector.shape_cast %5 : vector<1x128xf32> to vector<1x1x128xf32>
    tpu.vector_store %arg3[%c0_3, %c0_4, %c0_5], %8 {strides = array<i32>} : memref<1x1x128xf32, #tpu.memory_space<vmem>>, vector<1x1x128xf32>,
    return
  }
  func.func @transform_0(%arg0: i32) -> (i32, i32) {
    %c0_i32 = arith.constant 0 : i32
    %c0_i32_0 = arith.constant 0 : i32
    return %arg0, %c0_i32 : i32, i32
  }
  func.func @transform_1(%arg0: i32) -> (i32, i32) {
    %c0_i32 = arith.constant 0 : i32
    %c0_i32_0 = arith.constant 0 : i32
    return %arg0, %c0_i32 : i32, i32
  }
  func.func @transform_2(%arg0: i32) -> (i32, i32, i32) {
    %c0_i32 = arith.constant 0 : i32
    %c0_i32_0 = arith.constant 0 : i32
    %c0_i32_1 = arith.constant 0 : i32
    return %arg0, %c0_i32, %c0_i32_0 : i32, i32, i32
  }
}

</mosaic_0001>

<bundles_post_ra>
// kernel: tpu_custom_call.1
= control target key start
LH: loop header
LB: loop body
LE: loop exit
PB: predicated region body
PF: predicated region fallthrough
CT: control target
= control target key end

     0   :  { %7 = vsyncpa [#allocation3], 0  ;;  %s194_s0 = inlined_call_operand.hbm [shape: f32[4,128], index: 0, kind: input, shape index: {}]   ;;  %s195_s1 = inlined_call_operand.hbm [shape: f32[4,128], index: 1, kind: input, shape index: {}]   ;;  %s196_s2 = inlined_call_operand.hbm [shape: f32[1,1,128], index: 2, kind: output, shape index: {}]  }
   0x1   :  { %8 = vsyncpa [#allocation6], 0 }
   0x2   :  { %9 = vsyncpa [#allocation4], 0  ;;  %s140_s9 = smov [#allocation2]   ;;  %s141_s11 = smov [#allocation5]  }
   0x3   :  { %s16_s10 = sshll.u32 %s140_s9, 4  ;;  %s26_s12 = sshll.u32 %s141_s11, 4  ;;  %s17_s10 = int_to_ptr.vmem [resolvable:$true] %s16_s10  ;;  %s27_s12 = int_to_ptr.vmem [resolvable:$true] %s26_s12 }
   0x4   :  { %s68_s15 = scalar_lea.hbm %s194_s0, 64 }
   0x5   :  { %p69_p0 = scmp.ne.s32.totalorder %s194_s0, %s68_s15  ;;  %p72_p1 = scmp.lt.u32.totalorder %s68_s15, %s194_s0 }
   0x7   :  { %p74_p2 = pnand %p72_p1, %p69_p0 }
   0x9   :  { %77 = shalt.err (!%p74_p2)
}
   0xa   :  { %s78_s20 = scalar_lea.vmem %s17_s10, 64  ;;  %p83_p4 = scmp.lt.s32.totalorder %s17_s10, %s17_s10 }
   0xb   :  { %p79_p3 = scmp.ne.s32.totalorder %s17_s10, %s78_s20  ;;  %p84_p5 = scmp.lt.s32.totalorder %s78_s20, %s78_s20 }
   0xd   :  { %p85_p6 = por %p84_p5, %p83_p4 }
   0xf   :  { %p86_p7 = pnand %p85_p6, %p79_p3 }
  0x11   :  { %89 = shalt.err (!%p86_p7)
}
  0x12   :  { %19 = dma.hbm_to_vmem [thread:$0]  %s194_s0, 64, %s17_s10, [#allocation3]  }
  0x13   :  { %s90_s25 = scalar_lea.hbm %s195_s1, 64 }
  0x14   :  { %p91_p8 = scmp.ne.s32.totalorder %s195_s1, %s90_s25  ;;  %p94_p9 = scmp.lt.u32.totalorder %s90_s25, %s195_s1 }
  0x16   :  { %p96_p10 = pnand %p94_p9, %p91_p8 }
  0x18   :  { %99 = shalt.err (!%p96_p10)
}
  0x19   :  { %s100_s30 = scalar_lea.vmem %s27_s12, 64  ;;  %p105_p12 = scmp.lt.s32.totalorder %s27_s12, %s27_s12 }
  0x1a   :  { %p101_p11 = scmp.ne.s32.totalorder %s27_s12, %s100_s30  ;;  %p106_p13 = scmp.lt.s32.totalorder %s100_s30, %s100_s30 }
  0x1c   :  { %p107_p0 = por %p106_p13, %p105_p12 }
  0x1e   :  { %p108_p1 = pnand %p107_p0, %p101_p11 }
  0x20   :  { %111 = shalt.err (!%p108_p1)
}
  0x21   :  { %29 = dma.hbm_to_vmem [thread:$0]  %s195_s1, 64, %s27_s12, [#allocation6]  }
  0x22   :  { %134 = dma.done.wait [#allocation3], 64  }
  0x23   :  { %135 = vsyncadd [#allocation3], 4294967232 }
  0x24   :  { %136 = dma.done.wait [#allocation6], 64  }
  0x25   :  { %137 = vsyncadd [#allocation6], 4294967232  ;;  %v36_v0 = vld [vmem:[#allocation5] sm:$0xf]  ;;  %v37_v1 = vld [vmem:[#allocation2] sm:$0xf] }
  0x26   :  { %v38_v2 = vsub.f32 %v36_v0, %v37_v1  ;;  %vm40_vm0 = vcmask 1043456   ;;  %s142_s4 = smov [#allocation7]  }
  0x27   :  { %s55_s5 = sshll.u32 %s142_s4, 4  ;;  %s56_s5 = int_to_ptr.vmem [resolvable:$true] %s55_s5 }
  0x28   :  { %v39_v3 = vmul.f32 %v38_v2, %v38_v2  ;;  %s112_s1 = scalar_lea.vmem %s56_s5, 16  ;;  %s116_s6 = scalar_lea.vmem %s56_s5, 32 }
  0x29   :  { %p113_p2 = scmp.ne.s32.totalorder %s56_s5, %s112_s1  ;;  %p117_p3 = scmp.lt.s32.totalorder %s56_s5, %s56_s5 }
  0x2a   :  { %v41_v4 = vsel %vm40_vm0, %v39_v3, 0.0  ;;  %p118_p4 = scmp.lt.s32.totalorder %s116_s6, %s112_s1 }
  0x2b   :  { %v42_v5 = vrot.slane %v41_v4, 4 }
  0x2c   :  { %p119_p5 = por %p118_p4, %p117_p3 }
  0x2d   :  { %v43_v6 = vadd.f32 %v42_v5, %v41_v4 }
  0x2e   :  { %p120_p6 = pnand %p119_p5, %p113_p2 }
  0x2f   :  { %v44_v7 = vrot.slane %v43_v6, 2 }
  0x31   :  { %v45_v8 = vadd.f32 %v44_v7, %v43_v6 }
  0x33   :  { %v46_v9 = vrot.slane %v45_v8, 1 }
  0x35   :  { %v47_v10 = vadd.f32 %v46_v9, %v45_v8 }
  0x37   :  { %48 = vst [vmem:[#allocation7] sm:$0x1] %v47_v10 }
  0x38   :  { %123 = shalt.err (!%p120_p6)
}
  0x39   :  { %s124_s9 = scalar_lea.hbm %s196_s2, 16 }
  0x3a   :  { %p125_p7 = scmp.ne.s32.totalorder %s196_s2, %s124_s9  ;;  %p128_p8 = scmp.lt.u32.totalorder %s124_s9, %s196_s2 }
  0x3c   :  { %p130_p9 = pnand %p128_p8, %p125_p7 }
  0x3e   :  { %133 = shalt.err (!%p130_p9)
}
  0x3f   :  { %58 = dma.vmem_to_hbm [thread:$0]  %s56_s5, 16, %s196_s2, [#allocation4]  }
  0x40   :  { %138 = dma.done.wait [#allocation4], 16  }
  0x41   :  { %139 = vsyncadd [#allocation4], 4294967280 }
  0x42   :  { %62 = vsyncpa [#allocation3], 1 }
  0x43   :  { %63 = vsyncpa [#allocation6], 1 }
  0x44   :  { %64 = vsyncpa [#allocation4], 1 }

</bundles_post_ra>
